<compile_context>
chip_gen: v7x
topology: tpu7x:2x2x1
jax: 0.10.0
libtpu: 0.0.40
codegen_flags: <defaults>
</compile_context>

<pallas_src>
import functools

import jax
import jax.numpy as jnp
from jax import lax
from jax.experimental import pallas as pl
from jax.experimental.pallas import tpu as pltpu


def amortized_both_kernel(
    x_ref,      # [tb, Din]   native layout; batch lands on lanes after the dot
    w1f_ref,    # [2H, Din]   fused first layer (rows 0..H-1: mu, H..2H-1: tau)
    b1f_ref,    # [2H, 1]
    w2t_ref,    # [H, H]      tau layer 2
    b2t_ref,    # [H, 1]
    whm_ref,    # [2, H]      rows: [w2_mu ; 0]
    wht_ref,    # [2, H]      rows: [0 ; w3_tau]
    bhead_ref,  # [2, 1]      (b2_mu, b3_tau)
    out_ref,    # [2, tb]     row 0 = mu, row 1 = tau
):
    H = w2t_ref.shape[0]
    x = x_ref[...]                                                     # [tb, Din]

    # Fused first layer for both nets in one MXU pass.  Contracting Din of both
    # operands transposes x inside the kernel (XLU) and keeps batch on lanes.
    hf = lax.dot_general(
        w1f_ref[...], x,
        dimension_numbers=(((1,), (1,)), ((), ())),
        preferred_element_type=jnp.float32,
    )                                                                  # [2H, tb]
    hf = jnp.maximum(hf + b1f_ref[...], 0.0)
    h_mu = hf[:H, :]                                                   # [H, tb]
    h1_t = hf[H:, :]                                                   # [H, tb]

    # tau trunk.
    h2 = jnp.dot(w2t_ref[...], h1_t, preferred_element_type=jnp.float32)
    h2 = jnp.maximum(h2 + b2t_ref[...], 0.0)                           # [H, tb]

    # Fused heads: block-diagonal [2, 2H] weight split into two [2, H] factors
    # so no [2H, tb] concat is materialized.  Row 0 = mu, row 1 = tau.
    heads = (
        jnp.dot(whm_ref[...], h_mu, preferred_element_type=jnp.float32)
        + jnp.dot(wht_ref[...], h2, preferred_element_type=jnp.float32)
        + bhead_ref[...]
    )                                                                  # [2, tb]
    out_ref[...] = heads.astype(out_ref.dtype)


# VMEM budget per lane column (f32, Din=16, H=32):
#   x (double-buffered) ~128 B + hf 256 B + h2 128 B + transpose/out slack
#   => ~0.6 KB/col, so 16384 columns ~ 10 MiB: comfortably inside the 48 MiB
#   limit below on every generation (v7x has only 64 MiB physical VMEM/TC;
#   v5e/v6e could push this to 32K-64K columns).
_MAX_TILE = 16384
_VMEM_LIMIT = 48 * 1024 * 1024


def _pick_batch_tile(bp, cap=_MAX_TILE):
    """bp is a multiple of 128. Return the largest 128-multiple tile dividing bp
    that is <= cap and leaves >= 2 grid steps when bp >= 256 (v7x megacore
    sharding + keeps the x double-buffer pipeline alive)."""
    if bp <= 128:
        return bp
    half = (bp // 2) // 128 * 128
    tb = min(cap, max(128, half))
    while bp % tb:
        tb -= 128
    return tb


def pack_params(p):
    """Pack PyTorch-layout params (w: [out, in], b: [out]) for the kernel."""
    H = p["w1_mu"].shape[0]
    zrow = jnp.zeros((1, H), jnp.float32)
    return dict(
        w1f=jnp.concatenate([p["w1_mu"], p["w1_tau"]], axis=0),             # [2H, Din]
        b1f=jnp.concatenate([p["b1_mu"], p["b1_tau"]], axis=0)[:, None],    # [2H, 1]
        w2t=p["w2_tau"],                                                    # [H, H]
        b2t=p["b2_tau"][:, None],                                           # [H, 1]
        whm=jnp.concatenate([p["w2_mu"], zrow], axis=0),                    # [2, H]
        wht=jnp.concatenate([zrow, p["w3_tau"]], axis=0),                   # [2, H]
        bhead=jnp.concatenate([p["b2_mu"], p["b3_tau"]], axis=0)[:, None],  # [2, 1]
    )


@functools.partial(jax.jit, static_argnames=("batch_tile",))
def amortized_both(x, packed, *, batch_tile=None):
    """x: [B, Din] float32; packed = pack_params(params). Returns (mu, tau), [B, 1] each."""
    B, Din = x.shape
    H = packed["w2t"].shape[0]

    # Pad the batch to a lane multiple so every tile is lane-dense and pipelined
    # (only copies x when B is not already a multiple of 128).
    Bp = ((B + 127) // 128) * 128
    xp = x if Bp == B else jnp.pad(x, ((0, Bp - B), (0, 0)))

    tb = _pick_batch_tile(Bp) if batch_tile is None else batch_tile
    assert Bp % tb == 0, "padded batch must be divisible by batch_tile"
    assert tb % 128 == 0, "batch_tile must be a multiple of 128"

    full = lambda shape: pl.BlockSpec(shape, lambda i: (0, 0))
    in_specs = [
        pl.BlockSpec((tb, Din), lambda i: (i, 0)),   # x streamed over the batch
        full((2 * H, Din)),                          # w1 fused (resident)
        full((2 * H, 1)),                            # b1 fused
        full((H, H)),                                # w2_tau
        full((H, 1)),                                # b2_tau
        full((2, H)),                                # head factor for h_mu
        full((2, H)),                                # head factor for h2
        full((2, 1)),                                # head biases
    ]
    out_specs = pl.BlockSpec((2, tb), lambda i: (0, i))

    out = pl.pallas_call(
        amortized_both_kernel,
        out_shape=jax.ShapeDtypeStruct((2, Bp), jnp.float32),
        grid_spec=pltpu.PrefetchScalarGridSpec(
            num_scalar_prefetch=0,
            grid=(Bp // tb,),
            in_specs=in_specs,
            out_specs=out_specs,
        ),
        compiler_params=pltpu.CompilerParams(
            dimension_semantics=("parallel",),
            vmem_limit_bytes=_VMEM_LIMIT,
        ),
    )(
        xp, packed["w1f"], packed["b1f"], packed["w2t"], packed["b2t"],
        packed["whm"], packed["wht"], packed["bhead"],
    )

    mu = out[0:1, :B].T    # [B, 1]
    tau = out[1:2, :B].T   # [B, 1]
    return mu, tau


def init_params(key, input_dim, hidden_dim):
    """Deterministic init mimicking nn.Linear defaults, in PyTorch layout:
    weights [out, in], biases [out]."""
    def linear(key, fan_in, fan_out):
        kw, kb = jax.random.split(key)
        bound = 1.0 / jnp.sqrt(fan_in)
        w = jax.random.uniform(kw, (fan_out, fan_in), jnp.float32, -bound, bound)
        b = jax.random.uniform(kb, (fan_out,), jnp.float32, -bound, bound)
        return w, b

    keys = jax.random.split(key, 5)
    w1m, b1m = linear(keys[0], input_dim, hidden_dim)
    w2m, b2m = linear(keys[1], hidden_dim, 1)
    w1t, b1t = linear(keys[2], input_dim, hidden_dim)
    w2t, b2t = linear(keys[3], hidden_dim, hidden_dim)
    w3t, b3t = linear(keys[4], hidden_dim, 1)
    return {
        "w1_mu": w1m, "b1_mu": b1m, "w2_mu": w2m, "b2_mu": b2m,
        "w1_tau": w1t, "b1_tau": b1t, "w2_tau": w2t, "b2_tau": b2t,
        "w3_tau": w3t, "b3_tau": b3t,
    }


def reference(x, p):
    h = jnp.maximum(x @ p["w1_mu"].T + p["b1_mu"], 0.0)
    mu = h @ p["w2_mu"].T + p["b2_mu"]
    h1 = jnp.maximum(x @ p["w1_tau"].T + p["b1_tau"], 0.0)
    h2 = jnp.maximum(h1 @ p["w2_tau"].T + p["b2_tau"], 0.0)
    tau = h2 @ p["w3_tau"].T + p["b3_tau"]
    return mu, tau


if __name__ == "__main__":
    key = jax.random.PRNGKey(0)
    kx, kp, kx2 = jax.random.split(key, 3)

    input_dim, hidden_dim = 16, 32
    params = init_params(kp, input_dim, hidden_dim)
    packed = pack_params(params)

    # Small, non-128-aligned batch: exercises the padding path (single tile).
    batch = 8
    x = jax.random.normal(kx, (batch, input_dim), jnp.float32)
    mu, tau = amortized_both(x, packed)
    jax.block_until_ready((mu, tau))
    mu_ref, tau_ref = reference(x, params)
    assert mu.shape == (batch, 1) and tau.shape == (batch, 1)
    assert jnp.allclose(mu, mu_ref, atol=1e-4, rtol=1e-4)
    assert jnp.allclose(tau, tau_ref, atol=1e-4, rtol=1e-4)

    # Lane-aligned batch: auto tile = B//2 = 256 -> grid of 2 (pipelined,
    # megacore-shardable path).
    batch2 = 512
    x2 = jax.random.normal(kx2, (batch2, input_dim), jnp.float32)
    mu2, tau2 = amortized_both(x2, packed)
    jax.block_until_ready((mu2, tau2))
    mu2_ref, tau2_ref = reference(x2, params)
    assert jnp.allclose(mu2, mu2_ref, atol=1e-4, rtol=1e-4)
    assert jnp.allclose(tau2, tau2_ref, atol=1e-4, rtol=1e-4)

    # Explicit smaller tile (grid of 4) still matches.
    mu3, tau3 = amortized_both(x2, packed, batch_tile=128)
    jax.block_until_ready((mu3, tau3))
    assert jnp.allclose(mu3, mu2_ref, atol=1e-4, rtol=1e-4)
    assert jnp.allclose(tau3, tau2_ref, atol=1e-4, rtol=1e-4)

    print("KERNEL_OK")
</pallas_src>

<mosaic_0001>
module attributes {stable_mosaic.version = 11 : i64} {
  func.func @amortized_both_kernel(%arg0: i32, %arg1: memref<128x16xf32, #tpu.memory_space<vmem>>, %arg2: memref<64x16xf32, #tpu.memory_space<vmem>>, %arg3: memref<64x1xf32, #tpu.memory_space<vmem>>, %arg4: memref<32x32xf32, #tpu.memory_space<vmem>>, %arg5: memref<32x1xf32, #tpu.memory_space<vmem>>, %arg6: memref<2x32xf32, #tpu.memory_space<vmem>>, %arg7: memref<2x32xf32, #tpu.memory_space<vmem>>, %arg8: memref<2x1xf32, #tpu.memory_space<vmem>>, %arg9: memref<2x128xf32, #tpu.memory_space<vmem>>) attributes {dimension_semantics = [#tpu.dimension_semantics<parallel>], iteration_bounds = array<i64: 1>, scalar_prefetch = 0 : i64, scratch_operands = 0 : i64, tpu.core_type = #tpu.core_type<tc>, window_params = [{transform_indices = @transform_0, window_bounds = array<i64: 128, 16>}, {pipeline_mode = #tpu.pipeline_mode<synchronous>, transform_indices = @transform_1, window_bounds = array<i64: 64, 16>}, {pipeline_mode = #tpu.pipeline_mode<synchronous>, transform_indices = @transform_2, window_bounds = array<i64: 64, 1>}, {pipeline_mode = #tpu.pipeline_mode<synchronous>, transform_indices = @transform_3, window_bounds = array<i64: 32, 32>}, {pipeline_mode = #tpu.pipeline_mode<synchronous>, transform_indices = @transform_4, window_bounds = array<i64: 32, 1>}, {pipeline_mode = #tpu.pipeline_mode<synchronous>, transform_indices = @transform_5, window_bounds = array<i64: 2, 32>}, {pipeline_mode = #tpu.pipeline_mode<synchronous>, transform_indices = @transform_6, window_bounds = array<i64: 2, 32>}, {pipeline_mode = #tpu.pipeline_mode<synchronous>, transform_indices = @transform_7, window_bounds = array<i64: 2, 1>}, {transform_indices = @transform_8, window_bounds = array<i64: 2, 128>}]} {
    %c0 = arith.constant 0 : index
    %c0_0 = arith.constant 0 : index
    %0 = vector.load %arg1[%c0, %c0_0] : memref<128x16xf32, #tpu.memory_space<vmem>>, vector<128x16xf32>
    %c0_1 = arith.constant 0 : index
    %c0_2 = arith.constant 0 : index
    %1 = vector.load %arg2[%c0_1, %c0_2] : memref<64x16xf32, #tpu.memory_space<vmem>>, vector<64x16xf32>
    %cst = arith.constant dense<0.000000e+00> : vector<64x128xf32>
    %2 = tpu.matmul %1, %0, %cst {dimension_numbers = #tpu.dot_dimension_numbers<[1], [1], [0], [0], [0, 0, 1, 0], [], []>} : vector<64x16xf32>, vector<128x16xf32>, vector<64x128xf32> -> vector<64x128xf32>
    %c0_3 = arith.constant 0 : index
    %c0_4 = arith.constant 0 : index
    %3 = vector.load %arg3[%c0_3, %c0_4] : memref<64x1xf32, #tpu.memory_space<vmem>>, vector<64x1xf32>
    %4 = vector.broadcast %3 : vector<64x1xf32> to vector<64x128xf32>
    %5 = arith.addf %2, %4 : vector<64x128xf32>
    %cst_5 = arith.constant 0.000000e+00 : f32
    %6 = vector.broadcast %cst_5 : f32 to vector<64x128xf32>
    %7 = arith.maximumf %5, %6 : vector<64x128xf32>
    %8 = vector.extract_strided_slice %7 {offsets = [0, 0], sizes = [32, 128], strides = [1, 1]} : vector<64x128xf32> to vector<32x128xf32>
    %9 = vector.extract_strided_slice %7 {offsets = [32, 0], sizes = [32, 128], strides = [1, 1]} : vector<64x128xf32> to vector<32x128xf32>
    %c0_6 = arith.constant 0 : index
    %c0_7 = arith.constant 0 : index
    %10 = vector.load %arg4[%c0_6, %c0_7] : memref<32x32xf32, #tpu.memory_space<vmem>>, vector<32x32xf32>
    %cst_8 = arith.constant dense<0.000000e+00> : vector<32x128xf32>
    %11 = tpu.matmul %10, %9, %cst_8 {dimension_numbers = #tpu.dot_dimension_numbers<[1], [0], [0], [1], [0, 0, 1, 1], [], []>} : vector<32x32xf32>, vector<32x128xf32>, vector<32x128xf32> -> vector<32x128xf32>
    %c0_9 = arith.constant 0 : index
    %c0_10 = arith.constant 0 : index
    %12 = vector.load %arg5[%c0_9, %c0_10] : memref<32x1xf32, #tpu.memory_space<vmem>>, vector<32x1xf32>
    %13 = vector.broadcast %12 : vector<32x1xf32> to vector<32x128xf32>
    %14 = arith.addf %11, %13 : vector<32x128xf32>
    %cst_11 = arith.constant 0.000000e+00 : f32
    %15 = vector.broadcast %cst_11 : f32 to vector<32x128xf32>
    %16 = arith.maximumf %14, %15 : vector<32x128xf32>
    %c0_12 = arith.constant 0 : index
    %c0_13 = arith.constant 0 : index
    %17 = vector.load %arg6[%c0_12, %c0_13] : memref<2x32xf32, #tpu.memory_space<vmem>>, vector<2x32xf32>
    %cst_14 = arith.constant dense<0.000000e+00> : vector<2x128xf32>
    %18 = tpu.matmul %17, %8, %cst_14 {dimension_numbers = #tpu.dot_dimension_numbers<[1], [0], [0], [1], [0, 0, 1, 1], [], []>} : vector<2x32xf32>, vector<32x128xf32>, vector<2x128xf32> -> vector<2x128xf32>
    %c0_15 = arith.constant 0 : index
    %c0_16 = arith.constant 0 : index
    %19 = vector.load %arg7[%c0_15, %c0_16] : memref<2x32xf32, #tpu.memory_space<vmem>>, vector<2x32xf32>
    %cst_17 = arith.constant dense<0.000000e+00> : vector<2x128xf32>
    %20 = tpu.matmul %19, %16, %cst_17 {dimension_numbers = #tpu.dot_dimension_numbers<[1], [0], [0], [1], [0, 0, 1, 1], [], []>} : vector<2x32xf32>, vector<32x128xf32>, vector<2x128xf32> -> vector<2x128xf32>
    %21 = arith.addf %18, %20 : vector<2x128xf32>
    %c0_18 = arith.constant 0 : index
    %c0_19 = arith.constant 0 : index
    %22 = vector.load %arg8[%c0_18, %c0_19] : memref<2x1xf32, #tpu.memory_space<vmem>>, vector<2x1xf32>
    %23 = vector.broadcast %22 : vector<2x1xf32> to vector<2x128xf32>
    %24 = arith.addf %21, %23 : vector<2x128xf32>
    %c0_20 = arith.constant 0 : index
    %c0_21 = arith.constant 0 : index
    %25 = vector.load %arg9[%c0_20, %c0_21] : memref<2x128xf32, #tpu.memory_space<vmem>>, vector<2x128xf32>
    tpu.vector_store %arg9[%c0_20, %c0_21], %24 {strides = array<i32>} : memref<2x128xf32, #tpu.memory_space<vmem>>, vector<2x128xf32>,
    return
  }
  func.func @transform_0(%arg0: i32) -> (i32, i32) {
    %c0_i32 = arith.constant 0 : i32
    %c0_i32_0 = arith.constant 0 : i32
    return %arg0, %c0_i32 : i32, i32
  }
  func.func @transform_1(%arg0: i32) -> (i32, i32) {
    %c0_i32 = arith.constant 0 : i32
    %c0_i32_0 = arith.constant 0 : i32
    %c0_i32_1 = arith.constant 0 : i32
    return %c0_i32, %c0_i32_0 : i32, i32
  }
  func.func @transform_2(%arg0: i32) -> (i32, i32) {
    %c0_i32 = arith.constant 0 : i32
    %c0_i32_0 = arith.constant 0 : i32
    %c0_i32_1 = arith.constant 0 : i32
    return %c0_i32, %c0_i32_0 : i32, i32
  }
  func.func @transform_3(%arg0: i32) -> (i32, i32) {
    %c0_i32 = arith.constant 0 : i32
    %c0_i32_0 = arith.constant 0 : i32
    %c0_i32_1 = arith.constant 0 : i32
    return %c0_i32, %c0_i32_0 : i32, i32
  }
  func.func @transform_4(%arg0: i32) -> (i32, i32) {
    %c0_i32 = arith.constant 0 : i32
    %c0_i32_0 = arith.constant 0 : i32
    %c0_i32_1 = arith.constant 0 : i32
    return %c0_i32, %c0_i32_0 : i32, i32
  }
  func.func @transform_5(%arg0: i32) -> (i32, i32) {
    %c0_i32 = arith.constant 0 : i32
    %c0_i32_0 = arith.constant 0 : i32
    %c0_i32_1 = arith.constant 0 : i32
    return %c0_i32, %c0_i32_0 : i32, i32
  }
  func.func @transform_6(%arg0: i32) -> (i32, i32) {
    %c0_i32 = arith.constant 0 : i32
    %c0_i32_0 = arith.constant 0 : i32
    %c0_i32_1 = arith.constant 0 : i32
    return %c0_i32, %c0_i32_0 : i32, i32
  }
  func.func @transform_7(%arg0: i32) -> (i32, i32) {
    %c0_i32 = arith.constant 0 : i32
    %c0_i32_0 = arith.constant 0 : i32
    %c0_i32_1 = arith.constant 0 : i32
    return %c0_i32, %c0_i32_0 : i32, i32
  }
  func.func @transform_8(%arg0: i32) -> (i32, i32) {
    %c0_i32 = arith.constant 0 : i32
    %c0_i32_0 = arith.constant 0 : i32
    return %c0_i32, %arg0 : i32, i32
  }
}

</mosaic_0001>

<bundles_post_ra>
// kernel: amortized_both.1
= control target key start
LH: loop header
LB: loop body
LE: loop exit
PB: predicated region body
PF: predicated region fallthrough
CT: control target
= control target key end

     0   :  { %vm101_vm0 = vcmask 130048   ;;  %v803_v3 = vmov 0   ;;  %vm315_vm2 = vcmask 261120   ;;  %vm805_vm3 = vmmov 0   ;;  %s1038_s0 = inlined_call_operand.vmem [shape: f32[128,16], index: 0, kind: input, shape index: {}]   ;;  %s1039_s1 = inlined_call_operand.vmem [shape: f32[64,16], index: 1, kind: input, shape index: {}]   ;;  %s1040_s2 = inlined_call_operand.vmem [shape: f32[64,1], index: 2, kind: input, shape index: {}]   ;;  %s1041_s4 = inlined_call_operand.vmem [shape: f32[32,1], index: 4, kind: input, shape index: {}]   ;;  %s1042_s7 = inlined_call_operand.vmem [shape: f32[2,1], index: 7, kind: input, shape index: {}]   ;;  %s1043_s3 = inlined_call_operand.vmem [shape: f32[32,32], index: 3, kind: input, shape index: {}]   ;;  %s1044_s6 = inlined_call_operand.vmem [shape: f32[2,32], index: 6, kind: input, shape index: {}]   ;;  %s1045_s5 = inlined_call_operand.vmem [shape: f32[2,32], index: 5, kind: input, shape index: {}]   ;;  %s1046_s8 = inlined_call_operand.vmem [shape: f32[2,128], index: 8, kind: output, shape index: {}]  }
   0x1   :  { %v29_v0 = vld [vmem:[%s1038_s0] sm:$0xff]  ;;  %v30_v1 = vld [vmem:[%s1038_s0 + $0x8] sm:$0xff]  ;;  %vm860_vm1 = vmpackc.low %vm101_vm0, %vm101_vm0  ;;  %801 = vset.pattern.permute.xlu0 %v803_v3  ;;  %802 = vset.pattern.permute.xlu1 %v803_v3 }
   0x2   :  { %v729_v4 = vpack.c.bf16 %v30_v1, %v29_v0  ;;  %v31_v5 = vld [vmem:[%s1038_s0 + $0x10] sm:$0xff]  ;;  %v32_v6 = vld [vmem:[%s1038_s0 + $0x18] sm:$0xff]  ;;  %v45_v8 = vld [vmem:[%s1039_s1] sm:$0xff] }
   0x3   :  { %v735_v7 = vpack.c.bf16 %v32_v6, %v31_v5  ;;  %v33_v9 = vld [vmem:[%s1038_s0 + $0x20] sm:$0xff]  ;;  %v34_v10 = vld [vmem:[%s1038_s0 + $0x28] sm:$0xff]  ;;  %681 = vmatprep.mubr.msk.f32.mxu0 %vm101_vm0, %v45_v8  ;;  %v59_v12 = vld [vmem:[%s1040_s2 + $0x30] sm:$0xff] }
   0x4   :  { %731 = vmatprep.subr.msk.bf16.mxu0 %vm860_vm1, %v729_v4  ;;  %v57_v11 = vld [vmem:[%s1040_s2 + $0x20] sm:$0xff]  ;;  %v741_v13 = vpack.c.bf16 %v34_v10, %v33_v9  ;;  %93 = vperm.xlu1 %802, %v59_v12   ;;  %v58_v14 = vld [vmem:[%s1040_s2 + $0x28] sm:$0xff]  ;;  %v60_v15 = vld [vmem:[%s1040_s2 + $0x38] sm:$0xff] }
   0x5   :  { %734 = vmatpush3.bf16.xpose.msk.msra.mxu0 %vm860_vm1, %v729_v4  ;;  %83 = vperm.xlu0 %801, %v57_v11   ;;  %v35_v16 = vld [vmem:[%s1038_s0 + $0x30] sm:$0xff]  ;;  %v36_v17 = vld [vmem:[%s1038_s0 + $0x38] sm:$0xff]  ;;  %v291_v18 = vld [vmem:[%s1041_s4] sm:$0xff] }
   0x6   :  { %737 = vmatprep.subr.msk.bf16.mxu0 %vm860_vm1, %v735_v7  ;;  %v292_v19 = vld [vmem:[%s1041_s4 + $0x8] sm:$0xff]  ;;  %v747_v20 = vpack.c.bf16 %v36_v17, %v35_v16  ;;  %v293_v21 = vld [vmem:[%s1041_s4 + $0x10] sm:$0xff]  ;;  %v294_v22 = vld [vmem:[%s1041_s4 + $0x18] sm:$0xff] }
   0x7   :  { %v37_v23 = vld [vmem:[%s1038_s0 + $0x40] sm:$0xff]  ;;  %v38_v24 = vld [vmem:[%s1038_s0 + $0x48] sm:$0xff]  ;;  %v55_v28 = vld [vmem:[%s1040_s2 + $0x10] sm:$0xff] }
   0x8   :  { %98 = vperm.xlu1 %802, %v60_v15   ;;  %v53_v25 = vld [vmem:[%s1040_s2] sm:$0xff]  ;;  %v54_v26 = vld [vmem:[%s1040_s2 + $0x8] sm:$0xff]  ;;  %v753_v27 = vpack.c.bf16 %v38_v24, %v37_v23  ;;  %v56_v29 = vld [vmem:[%s1040_s2 + $0x18] sm:$0xff] }
   0x9   :  { %88 = vperm.xlu0 %801, %v58_v14   ;;  %v39_v30 = vld [vmem:[%s1038_s0 + $0x50] sm:$0xff]  ;;  %v40_v31 = vld [vmem:[%s1038_s0 + $0x58] sm:$0xff]  ;;  %v565_v32 = vld [vmem:[%s1042_s7] sm:$0x3] }
   0xa   :  { %v759_v33 = vpack.c.bf16 %v40_v31, %v39_v30  ;;  %v41_v34 = vld [vmem:[%s1038_s0 + $0x60] sm:$0xff]  ;;  %v42_v35 = vld [vmem:[%s1038_s0 + $0x68] sm:$0xff]  ;;  %v43_v37 = vld [vmem:[%s1038_s0 + $0x70] sm:$0xff] }
   0xb   :  { %v765_v36 = vpack.c.bf16 %v42_v35, %v41_v34  ;;  %v44_v38 = vld [vmem:[%s1038_s0 + $0x78] sm:$0xff]  ;;  %v46_v40 = vld [vmem:[%s1039_s1 + $0x8] sm:$0xff]  ;;  %v47_v41 = vld [vmem:[%s1039_s1 + $0x10] sm:$0xff] }
   0xc   :  { %302 = vperm.xlu1 %802, %v292_v19   ;;  %v771_v39 = vpack.c.bf16 %v44_v38, %v43_v37  ;;  %v48_v42 = vld [vmem:[%s1039_s1 + $0x18] sm:$0xff]  ;;  %v49_v43 = vld [vmem:[%s1039_s1 + $0x20] sm:$0xff]  ;;  %v50_v44 = vld [vmem:[%s1039_s1 + $0x28] sm:$0xff] }
   0xd   :  { %740 = vmatpush3.bf16.xpose.msk.msra.mxu0 %vm860_vm1, %v735_v7  ;;  %297 = vperm.xlu0 %801, %v291_v18   ;;  %v51_v45 = vld [vmem:[%s1039_s1 + $0x30] sm:$0xff]  ;;  %v52_v46 = vld [vmem:[%s1039_s1 + $0x38] sm:$0xff]  ;;  %v287_v47 = vld [vmem:[%s1043_s3] sm:$0xff] }
   0xe   :  { %743 = vmatprep.subr.msk.bf16.mxu0 %vm860_vm1, %v741_v13  ;;  %701 = vmatprep.mubr.msk.f32.mxu1 %vm315_vm2, %v287_v47  ;;  %v288_v24 = vld [vmem:[%s1043_s3 + $0x8] sm:$0xff] }
  0x10   :  { %312 = vperm.xlu1 %802, %v294_v22  }
  0x11   :  { %307 = vperm.xlu0 %801, %v293_v21  }
  0x14   :  { %68 = vperm.xlu1 %802, %v54_v26   ;;  %v290_v26 = vld [vmem:[%s1043_s3 + $0x18] sm:$0xff] }
  0x15   :  { %746 = vmatpush3.bf16.xpose.msk.msra.mxu0 %vm860_vm1, %v741_v13  ;;  %63 = vperm.xlu0 %801, %v53_v25   ;;  %v289_v25 = vld [vmem:[%s1043_s3 + $0x10] sm:$0xff] }
  0x16   :  { %749 = vmatprep.subr.msk.bf16.mxu0 %vm860_vm1, %v747_v20 }
  0x18   :  { %78 = vperm.xlu1 %802, %v56_v29  }
  0x19   :  { %73 = vperm.xlu0 %801, %v55_v28   ;;  %v806_v28 = vmov 0.0  }
  0x1d   :  { %752 = vmatpush3.bf16.xpose.msk.msra.mxu0 %vm860_vm1, %v747_v20  ;;  %568 = vperm.xlu0 %801, %v565_v32  }
  0x1e   :  { %755 = vmatprep.subr.msk.bf16.mxu0 %vm860_vm1, %v753_v27 }
  0x25   :  { %758 = vmatpush3.bf16.xpose.msk.msra.mxu0 %vm860_vm1, %v753_v27  ;;  %v804_v27 = vmov 0.0|0.0  }
  0x26   :  { %761 = vmatprep.subr.msk.bf16.mxu0 %vm860_vm1, %v759_v33 }
  0x2d   :  { %764 = vmatpush3.bf16.xpose.msk.msra.mxu0 %vm860_vm1, %v759_v33 }
  0x2e   :  { %767 = vmatprep.subr.msk.bf16.mxu0 %vm860_vm1, %v765_v36 }
  0x35   :  { %770 = vmatpush3.bf16.xpose.msk.msra.mxu0 %vm860_vm1, %v765_v36 }
  0x36   :  { %773 = vmatprep.subr.msk.bf16.mxu0 %vm860_vm1, %v771_v39 }
  0x3d   :  { %776 = vmatpush3.bf16.xpose.msk.msra.mxu0 %vm860_vm1, %v771_v39 }
  0x44   :  { %682 = vmatmul.mubr.msk.f32.vlgmr.msra.gmra.mrb[0].mxu0 %vm101_vm0, %v46_v40 }
  0x45   :  { %684 = vmatprep.mubr.msk.f32.mxu0 %vm101_vm0, %v47_v41 }
  0x48   :  { %685 = vmatmul.mubr.msk.f32.gmra.mrb[2].mxu0 %vm101_vm0, %v48_v42 }
  0x49   :  { %687 = vmatprep.mubr.msk.f32.mxu0 %vm101_vm0, %v49_v43  ;;  %v418_v43 = vld [vmem:[%s1044_s6] sm:$0x3] }
  0x4c   :  { %688 = vmatmul.mubr.msk.f32.gmra.mrb[4].mxu0 %vm101_vm0, %v50_v44  ;;  %v417_v44 = vld [vmem:[%s1045_s5] sm:$0x3] }
  0x4d   :  { %690 = vmatprep.mubr.msk.f32.mxu0 %vm101_vm0, %v51_v45 }
  0x50   :  { %691 = vmatmul.mubr.msk.f32.gmra.mrb[6].mxu0 %vm101_vm0, %v52_v46 }
  0x83   :  { %v94_v48 = vpop.permute.xlu1 %93 }
  0x84   :  { %v84_v49 = vpop.permute.xlu0 %83 }
  0x87   :  { %v99_v50 = vpop.permute.xlu1 %98 }
  0x88   :  { %v89_v51 = vpop.permute.xlu0 %88 }
  0x8b   :  { %v303_v52 = vpop.permute.xlu1 %302 }
  0x8c   :  { %v298_v53 = vpop.permute.xlu0 %297 }
  0x8f   :  { %v313_v54 = vpop.permute.xlu1 %312 }
  0x90   :  { %v308_v55 = vpop.permute.xlu0 %307 }
  0x93   :  { %v69_v56 = vpop.permute.xlu1 %68 }
  0x94   :  { %v64_v57 = vpop.permute.xlu0 %63 }
  0x97   :  { %v79_v62 = vpop.permute.xlu1 %78 }
  0x98   :  { %v74_v2 = vpop.permute.xlu0 %73 }
 0x117   :  { %v683_v58 = vpop.f32.mrb[0].mxu0 }
 0x118   :  { %v246_v59 = vadd.f32 %v683_v58, %v69_v56  ;;  %v240_v60 = vpop.f32.mrb[1].mxu0 }
 0x119   :  { %v241_v61 = vadd.f32 %v240_v60, %v64_v57 }
 0x11a   :  { %v280_v63 = vmax.f32 %v246_v59, 0.0 }
 0x11b   :  { %v279_v0 = vmax.f32 %v241_v61, 0.0  ;;  %v686_v1 = vpop.f32.mrb[2].mxu0 }
 0x11c   :  { %v256_v3 = vadd.f32 %v686_v1, %v79_v62  ;;  %v250_v4 = vpop.f32.mrb[3].mxu0 }
 0x11d   :  { %v792_v5 = vpack.c.bf16 %v280_v63, %v279_v0  ;;  %v251_v6 = vadd.f32 %v250_v4, %v74_v2 }
 0x11e   :  { %v282_v7 = vmax.f32 %v256_v3, 0.0 }
 0x11f   :  { %v281_v8 = vmax.f32 %v251_v6, 0.0  ;;  %v689_v9 = vpop.f32.mrb[4].mxu0 }
 0x120   :  { %v266_v10 = vadd.f32 %v689_v9, %v89_v51  ;;  %v260_v11 = vpop.f32.mrb[5].mxu0 }
 0x121   :  { %v795_v12 = vpack.c.bf16 %v282_v7, %v281_v8  ;;  %v261_v13 = vadd.f32 %v260_v11, %v84_v49 }
 0x122   :  { %v284_v14 = vmax.f32 %v266_v10, 0.0 }
 0x123   :  { %v283_v15 = vmax.f32 %v261_v13, 0.0  ;;  %v692_v16 = vpop.f32.mrb[6].mxu0 }
 0x124   :  { %v276_v17 = vadd.f32 %v692_v16, %v99_v50  ;;  %v270_v18 = vpop.f32.mrb[7].mxu0  ;;  %v569_v50 = vpop.permute.xlu0 %568 }
 0x125   :  { %v271_v19 = vadd.f32 %v270_v18, %v94_v48  ;;  %v777_v20 = vpack.c.bf16 %v284_v14, %v283_v15 }
 0x126   :  { %v286_v21 = vmax.f32 %v276_v17, 0.0 }
 0x127   :  { %v285_v22 = vmax.f32 %v271_v19, 0.0  ;;  %778 = vmatprep.subr.bf16.mxu1 %v777_v20 }
 0x128   :  { %780 = vmatpush3.bf16.msra.mxu1 %v777_v20 }
 0x129   :  { %v781_v23 = vpack.c.bf16 %v286_v21, %v285_v22 }
 0x12b   :  { %782 = vmatprep.subr.bf16.mxu1 %v781_v23 }
 0x12c   :  { %784 = vmatpush3.bf16.msra.mxu1 %v781_v23 }
 0x12d   :  { %785 = vmatprep.subr.bf16.mxu1 %v804_v27 }
 0x12f   :  { %702 = vmatmul.mubr.msk.f32.vlgmr.msra.gmra.mrb[0].mxu1 %vm315_vm2, %v288_v24 }
 0x130   :  { %704 = vmatprep.mubr.msk.f32.mxu1 %vm315_vm2, %v289_v25 }
 0x133   :  { %705 = vmatmul.mubr.msk.f32.gmra.mrb[2].mxu1 %vm315_vm2, %v290_v26 }
 0x134   :  { %715 = vmatprep.mubr.msk.f32.mxu1 %vm805_vm3, %v806_v28 }
 0x202   :  { %v703_v29 = vpop.f32.mrb[0].mxu1 }
 0x203   :  { %v400_v30 = vadd.f32 %v703_v29, %v303_v52  ;;  %v394_v31 = vpop.f32.mrb[1].mxu1 }
 0x204   :  { %v395_v32 = vadd.f32 %v394_v31, %v298_v53 }
 0x205   :  { %v414_v33 = vmax.f32 %v400_v30, 0.0 }
 0x206   :  { %v413_v34 = vmax.f32 %v395_v32, 0.0  ;;  %v706_v35 = vpop.f32.mrb[2].mxu1 }
 0x207   :  { %v410_v36 = vadd.f32 %v706_v35, %v313_v54  ;;  %v404_v37 = vpop.f32.mrb[3].mxu1 }
 0x208   :  { %v786_v38 = vpack.c.bf16 %v414_v33, %v413_v34  ;;  %v405_v39 = vadd.f32 %v404_v37, %v308_v55 }
 0x209   :  { %v416_v40 = vmax.f32 %v410_v36, 0.0 }
 0x20a   :  { %v415_v41 = vmax.f32 %v405_v39, 0.0  ;;  %787 = vmatpush3.bf16.msra.mxu1 %v786_v38 }
 0x20b   :  { %788 = vmatprep.subr.bf16.mxu1 %v804_v27 }
 0x20c   :  { %v789_v42 = vpack.c.bf16 %v416_v40, %v415_v41 }
 0x20e   :  { %790 = vmatpush3.bf16.msra.mxu1 %v789_v42 }
 0x20f   :  { %791 = vmatprep.subr.bf16.mxu1 %v804_v27 }
 0x211   :  { %716 = vmatmul.mubr.msk.f32.vlgmr.msra.gmra.mrb[4].mxu1 %vm315_vm2, %v418_v43 }
 0x212   :  { %793 = vmatpush3.bf16.msra.mxu1 %v792_v5  ;;  %726 = vmatprep.mubr.msk.f32.mxu1 %vm805_vm3, %v806_v28 }
 0x213   :  { %794 = vmatprep.subr.bf16.mxu1 %v804_v27 }
 0x216   :  { %796 = vmatpush3.bf16.msra.mxu1 %v795_v12 }
 0x219   :  { %727 = vmatmul.mubr.msk.f32.vlgmr.msra.gmra.mrb[6].mxu1 %vm315_vm2, %v417_v44 }
 0x2e4   :  { %v488_v45 = vpop.f32.mrb[4].mxu1 }
 0x2e5   :  { %v717_v46 = vpop.f32.mrb[5].mxu1 }
 0x2ec   :  { %v561_v47 = vpop.f32.mrb[6].mxu1 }
 0x2ed   :  { %v562_v48 = vadd.f32 %v561_v47, %v488_v45  ;;  %v728_v49 = vpop.f32.mrb[7].mxu1 }
 0x2ef   :  { %v571_v51 = vadd.f32 %v569_v50, %v562_v48 }
 0x2f1   :  { %572 = vst [vmem:[%s1046_s8] sm:$0x3] %v571_v51 }

</bundles_post_ra>
